<compile_context>
chip_gen: v5e
topology: v5e:2x2
jax: 0.10.0
libtpu: 0.0.40
codegen_flags: <defaults>
</compile_context>

<pallas_src>
import jax
import jax.numpy as jnp
from jax.experimental import pallas as pl
from jax.experimental.pallas import tpu as pltpu


# ----------------------------------------------------------------------------
# Kernel: relu(x * 5 - 40), dtype-preserving.
# ----------------------------------------------------------------------------
def _model_kernel(x_ref, o_ref):
    x = x_ref[...]
    y = jnp.maximum(x * 5.0 - 40.0, 0.0)
    o_ref[...] = y.astype(o_ref.dtype)


# ----------------------------------------------------------------------------
# Small-shape path: whole array resident in VMEM, no grid, no pipelining.
# ----------------------------------------------------------------------------
def _forward_small(x: jax.Array) -> jax.Array:
    return pl.pallas_call(
        _model_kernel,
        out_shape=jax.ShapeDtypeStruct(x.shape, x.dtype),
        in_specs=[pl.BlockSpec(memory_space=pltpu.MemorySpace.VMEM)],
        out_specs=pl.BlockSpec(memory_space=pltpu.MemorySpace.VMEM),
    )(x)


# ----------------------------------------------------------------------------
# Generation-aware VMEM budgeting helpers (all static / trace-time).
# ----------------------------------------------------------------------------
_LANE_COLS = 512  # lane-dense slab width: 4 * 128


def _vmem_capacity_bytes() -> int:
    try:
        return int(pltpu.get_tpu_info().vmem_capacity_bytes)
    except Exception:
        return 64 << 20  # conservative fallback (v7x per-TC VMEM)


def _native_sublane(itemsize: int) -> int:
    # f32 -> 8, bf16/f16 -> 16, int8/fp8 -> 32
    return max(8, 32 // max(1, itemsize))


def _choose_row_tile(rows: int, itemsize: int, vmem_cap: int) -> int:
    sub = _native_sublane(itemsize)
    # ~1/6 of physical VMEM per buffer; in + out, double-buffered = 4 buffers
    # -> 2/3 of VMEM working set, under the 3/4 vmem_limit_bytes we request.
    per_buf_budget = max(vmem_cap // 6, sub * _LANE_COLS * itemsize)
    tile_r = per_buf_budget // (_LANE_COLS * itemsize)
    tile_r = max(sub, (tile_r // sub) * sub)
    # Guarantee >= 2 grid blocks when there is enough data, so the
    # "parallel" axis actually uses both TensorCores on v7x.
    if rows >= 2 * sub:
        half = -(-rows // 2)                 # ceil(rows / 2)
        half = -(-half // sub) * sub         # round up to sublane multiple
        tile_r = min(tile_r, half)
    return max(sub, tile_r)


# ----------------------------------------------------------------------------
# Tiled path: flatten to a lane-dense slab, 1-D row grid, "parallel" axis.
# ----------------------------------------------------------------------------
def _forward_tiled(x: jax.Array) -> jax.Array:
    orig_shape = x.shape
    dtype = x.dtype
    itemsize = dtype.itemsize
    n = x.size

    sub = _native_sublane(itemsize)
    chunk = _LANE_COLS * sub
    pad = (-n) % chunk

    flat = x.reshape(-1)
    if pad:
        flat = jnp.pad(flat, (0, pad))
    rows = flat.size // _LANE_COLS
    slab = flat.reshape(rows, _LANE_COLS)

    vmem_cap = _vmem_capacity_bytes()
    tile_r = _choose_row_tile(rows, itemsize, vmem_cap)
    grid = (pl.cdiv(rows, tile_r),)

    out_slab = pl.pallas_call(
        _model_kernel,
        out_shape=jax.ShapeDtypeStruct((rows, _LANE_COLS), dtype),
        grid=grid,
        in_specs=[pl.BlockSpec((tile_r, _LANE_COLS), lambda i: (i, 0))],
        out_specs=pl.BlockSpec((tile_r, _LANE_COLS), lambda i: (i, 0)),
        input_output_aliases={0: 0},
        compiler_params=pltpu.CompilerParams(
            dimension_semantics=("parallel",),   # 2 TCs on v7x; no-op elsewhere
            vmem_limit_bytes=int(vmem_cap * 3 // 4),
        ),
    )(slab)

    return out_slab.reshape(-1)[:n].reshape(orig_shape)


# Anything at or below this many bytes is pure fixed-overhead territory:
# take the gridless single-block path.
_SMALL_BYTES = 2 << 20  # 2 MiB


def model_forward(x1: jax.Array) -> jax.Array:
    """Runs relu(x1 * 5 - 40) via a Pallas TPU kernel."""
    nbytes = x1.size * x1.dtype.itemsize
    if nbytes <= _SMALL_BYTES:
        return _forward_small(x1)
    return _forward_tiled(x1)


if __name__ == "__main__":
    key = jax.random.PRNGKey(0)

    # 1) Same shape as the PyTorch example: x1 = torch.randn(3, 4)
    x_small = jax.random.normal(key, (3, 4), dtype=jnp.float32)
    out_small = model_forward(x_small)
    jax.block_until_ready(out_small)
    ref_small = jnp.maximum(x_small * 5.0 - 40.0, 0.0)
    assert out_small.shape == (3, 4)
    assert out_small.dtype == jnp.float32
    assert jnp.allclose(out_small, ref_small, atol=1e-6), "small-path mismatch"

    # 2) Exercise the flattened / lane-dense tiled path on an odd 2-D shape
    #    (feature dim not a multiple of 128 -> tests padding + un-padding).
    key2 = jax.random.PRNGKey(1)
    x_mid = jax.random.normal(key2, (1003, 257), dtype=jnp.float32)
    out_mid = _forward_tiled(x_mid)
    jax.block_until_ready(out_mid)
    ref_mid = jnp.maximum(x_mid * 5.0 - 40.0, 0.0)
    assert out_mid.shape == x_mid.shape
    assert out_mid.dtype == x_mid.dtype
    assert jnp.allclose(out_mid, ref_mid, atol=1e-5), "tiled-path mismatch"

    # 3) dtype-preserving check on bf16 (native sublane packing = 16).
    key3 = jax.random.PRNGKey(2)
    x_bf16 = jax.random.normal(key3, (256, 384), dtype=jnp.bfloat16)
    out_bf16 = _forward_tiled(x_bf16)
    jax.block_until_ready(out_bf16)
    ref_bf16 = jnp.maximum(x_bf16 * 5.0 - 40.0, 0.0)
    assert out_bf16.dtype == jnp.bfloat16
    assert jnp.allclose(out_bf16.astype(jnp.float32),
                        ref_bf16.astype(jnp.float32),
                        atol=5e-2, rtol=5e-2), "bf16-path mismatch"

    print("KERNEL_OK")
</pallas_src>

<mosaic_0001>
module attributes {stable_mosaic.version = 11 : i64} {
  func.func @_model_kernel(%arg0: memref<3x4xf32, #tpu.memory_space<vmem>>, %arg1: memref<3x4xf32, #tpu.memory_space<vmem>>) attributes {dimension_semantics = [], scalar_prefetch = 0 : i64, scratch_operands = 0 : i64, tpu.core_type = #tpu.core_type<tc>} {
    %c0 = arith.constant 0 : index
    %c0_0 = arith.constant 0 : index
    %0 = vector.load %arg0[%c0, %c0_0] : memref<3x4xf32, #tpu.memory_space<vmem>>, vector<3x4xf32>
    %cst = arith.constant 5.000000e+00 : f32
    %1 = vector.broadcast %cst : f32 to vector<3x4xf32>
    %2 = arith.mulf %0, %1 : vector<3x4xf32>
    %cst_1 = arith.constant 4.000000e+01 : f32
    %3 = vector.broadcast %cst_1 : f32 to vector<3x4xf32>
    %4 = arith.subf %2, %3 : vector<3x4xf32>
    %cst_2 = arith.constant 0.000000e+00 : f32
    %5 = vector.broadcast %cst_2 : f32 to vector<3x4xf32>
    %6 = arith.maximumf %4, %5 : vector<3x4xf32>
    %c0_3 = arith.constant 0 : index
    %c0_4 = arith.constant 0 : index
    %7 = vector.load %arg1[%c0_3, %c0_4] : memref<3x4xf32, #tpu.memory_space<vmem>>, vector<3x4xf32>
    tpu.vector_store %arg1[%c0_3, %c0_4], %6 {strides = array<i32>} : memref<3x4xf32, #tpu.memory_space<vmem>>, vector<3x4xf32>,
    return
  }
}

</mosaic_0001>

<bundles_post_ra>
// kernel: tpu_custom_call.1
= control target key start
LH: loop header
LB: loop body
LE: loop exit
PB: predicated region body
PF: predicated region fallthrough
CT: control target
= control target key end

     0   :  { %6 = vsyncpa [#allocation3], 0  ;;  %s119_s0 = inlined_call_operand.hbm [shape: f32[3,4], index: 0, kind: input, shape index: {}]   ;;  %s120_s1 = inlined_call_operand.hbm [shape: f32[3,4], index: 1, kind: output, shape index: {}]  }
   0x1   :  { %7 = vsyncpa [#allocation4], 0  ;;  %s13_s8 = sshll.u32 %s119_s0, 4  ;;  %s101_s9 = smov [#allocation2]   ;;  %s14_s8 = int_to_ptr.hbm [resolvable:$true] %s13_s8 }
   0x2   :  { %s15_s10 = sshll.u32 %s101_s9, 4  ;;  %s16_s10 = int_to_ptr.vmem [resolvable:$true] %s15_s10 }
   0x3   :  { %18 = dma.hbm_to_vmem [thread:$0]  %s14_s8, 64, %s16_s10, [#allocation3]  }
   0x4   :  { %97 = dma.done.wait [#allocation3], 64  }
   0x5   :  { %98 = vsyncadd [#allocation3], 4294967232  ;;  %v23_v0 = vld [vmem:[#allocation2] sm:$0x7]  ;;  %s102_s11 = smov [#allocation5]   ;;  %s36_s15 = sshll.u32 %s120_s1, 4  ;;  %s37_s15 = int_to_ptr.hbm [resolvable:$true] %s36_s15 }
   0x6   :  { %v24_v1 = vmul.f32 5.0, %v23_v0  ;;  %s34_s12 = sshll.u32 %s102_s11, 4  ;;  %vm27_vm0 = vcmask 26624   ;;  %s35_s12 = int_to_ptr.vmem [resolvable:$true] %s34_s12 }
   0x8   :  { %v46_v2 = vadd.f32 -40.0, %v24_v1 }
   0xa   :  { %v26_v3 = vmax.f32 %v46_v2, 0.0 }
   0xc   :  { %28 = vst.msk [vmem:[#allocation5] sm:$0x7] %vm27_vm0, %v26_v3 }
   0xd   :  { %39 = dma.vmem_to_hbm [thread:$0]  %s35_s12, 64, %s37_s15, [#allocation4]  }
   0xe   :  { %99 = dma.done.wait [#allocation4], 64  }
   0xf   :  { %100 = vsyncadd [#allocation4], 4294967232 }
  0x10   :  { %44 = vsyncpa [#allocation3], 1 }
  0x11   :  { %45 = vsyncpa [#allocation4], 1 }

</bundles_post_ra>
